<compile_context>
chip_gen: v5e
topology: v5e:2x2
jax: 0.10.0
libtpu: 0.0.40
codegen_flags: <defaults>
</compile_context>

<pallas_src>
import functools

import numpy as np
import jax
import jax.numpy as jnp
from jax import lax
from jax.experimental import pallas as pl
from jax.experimental.pallas import tpu as pltpu


def _hcc_euc_kernel(x_ref, x2_ref, hcm2_ref, hc2_ref, pid_ref, pidhc_ref,
                    out_ref, *, block_n, steps_per_core, mid_n, mid_m, margin,
                    precision):
    # x_ref     : (TN, C)    f32/bf16  streamed sample-feature tile
    # x2_ref    : (1, TN)    f32       streamed ||x||^2 row
    # hcm2_ref  : (M, C)     f32/bf16  resident -2 * centroids
    # hc2_ref   : (M, 1)     f32       resident ||hc||^2
    # pid_ref   : (1, TN)    i32       streamed sample pids
    # pidhc_ref : (M, 1)     i32       resident centroid pids
    # out_ref   : (1, M, 2)  f32       per-core resident partial sums
    g = pl.program_id(0)
    i = pl.program_id(1)

    @pl.when(i == 0)
    def _init():
        out_ref[...] = jnp.zeros_like(out_ref)

    # cross[j, s] = -2 * <hc_j, x_s>, produced directly in the transposed
    # (M, TN) layout so the big sample axis sits on lanes.
    cross = lax.dot_general(hcm2_ref[...], x_ref[...],
                            (((1,), (1,)), ((), ())),
                            preferred_element_type=jnp.float32,
                            precision=precision)                  # (M, TN) f32

    d2 = hc2_ref[...] + x2_ref[...] + cross                        # broadcast adds
    dist = jnp.sqrt(jnp.maximum(d2, 1e-12))

    m, tn = dist.shape
    pid_eq = pidhc_ref[...] == pid_ref[...]                        # (M, TN) bool

    # Off-diagonal block selector as XOR of two 1-D comparisons.
    samp = (block_n * (g * steps_per_core + i)
            + lax.broadcasted_iota(jnp.int32, (1, tn), 1))
    cent = lax.broadcasted_iota(jnp.int32, (m, 1), 0)
    blk = jnp.logical_xor(samp < mid_n, cent < mid_m)              # (M, TN) bool

    sel1 = jnp.logical_and(pid_eq, blk).astype(jnp.float32)
    neg = jnp.logical_not(pid_eq).astype(jnp.float32)
    hinge = jnp.maximum(margin - dist, 0.0)

    num1 = jnp.sum(dist * sel1, axis=1, keepdims=True)             # (M, 1)
    num2 = jnp.sum(hinge * neg, axis=1, keepdims=True)             # (M, 1)
    out_ref[...] += jnp.concatenate([num1, num2], axis=1).reshape(1, m, 2)
    # NOTE: if a profile shows the x DMA exposed, add
    # pipeline_mode=pl.Buffered(3) on the x BlockSpec (check VMEM headroom on v7x).


def _vmem_limit_bytes():
    """Generation-aware scoped-VMEM limit (smaller on v7x, larger on v5e/v6e)."""
    cap = 64 * 1024 * 1024  # conservative fallback (v7x physical VMEM per TC)
    try:
        info = pltpu.get_tpu_info()
        for name in ("vmem_capacity_bytes", "vmem_size_bytes", "vmem_bytes"):
            v = getattr(info, name, None)
            if v:
                cap = int(v)
                break
    except Exception:
        pass
    return min(int(cap * 0.75), 100 * 1024 * 1024)


def _pick_block_n(n, c, m, x_bytes, budget_bytes, max_rows=4096):
    """Largest multiple of 128 dividing n whose working set fits the budget."""
    best = None
    t = 128
    while t <= min(n, max_rows):
        if n % t == 0:
            foot = (2 * t * c * x_bytes          # double-buffered x tile
                    + 2 * t * 8                  # pid + ||x||^2 rows (dbl-buf)
                    + 6 * m * t * 4)             # (M, TN) f32 temporaries
            if foot <= budget_bytes:
                best = t
        t += 128
    if best is None:
        best = 128 if n % 128 == 0 else n        # full-array block fallback
    return best


def hcc_euc_loss(x, pids, margin_euc=0.6, num_pids=None, block_n=None,
                 cross_in_bf16=False):
    """Forward pass of hcc_euc. x: (N, C) float features, pids: (N,) int."""
    x = jnp.asarray(x, jnp.float32)
    pids = jnp.asarray(pids, jnp.int32)
    N, C = x.shape

    if num_pids is None:
        # Data-dependent (len(pids.unique()) in the module). Host fallback only
        # works outside jit; pass num_pids explicitly (static) when jitting.
        num_pids = int(np.unique(np.asarray(pids)).size)
    M = 2 * num_pids
    if N % M != 0:
        raise ValueError(f"N={N} must be M={M} contiguous equal-size groups")

    pidhc = pids.reshape(M, -1)[:, 0]                       # (M,)
    hcen = x.reshape(M, -1, C).mean(axis=1)                 # (M, C) f32
    hc2 = jnp.sum(hcen * hcen, axis=1, keepdims=True)       # (M, 1) f32
    hcm2 = -2.0 * hcen                                      # (M, C)
    x2_row = jnp.sum(x * x, axis=1).reshape(1, N)           # (1, N) f32
    pid_row = pids.reshape(1, N)
    pidhc_col = pidhc.reshape(M, 1)

    # Denominators are pure functions of pids -> compute once in the wrapper
    # (drops two in-kernel lane reductions per step).
    half_n, half_m = N // 2, M // 2
    pid_eq = pidhc_col == pid_row                           # (M, N) bool (tiny)
    offdiag = jnp.logical_xor(jnp.arange(M)[:, None] < half_m,
                              jnp.arange(N)[None, :] < half_n)
    den1 = jnp.sum(jnp.logical_and(pid_eq, offdiag).astype(jnp.float32))
    den2 = jnp.sum(jnp.logical_not(pid_eq).astype(jnp.float32))

    vmem_limit = _vmem_limit_bytes()
    x_bytes = 2 if cross_in_bf16 else 4
    tn = (int(block_n) if block_n is not None
          else _pick_block_n(N, C, M, x_bytes, int(vmem_limit * 0.7)))
    if N % tn != 0:
        raise ValueError(f"block_n={tn} must divide N={N}")
    steps = N // tn
    # Split the sample loop over both TensorCores on v7x (harmless extra loop
    # level on single-core v5e/v6e); each core owns its (1, M, 2) partial block.
    G = 2 if steps % 2 == 0 else 1
    steps_per_core = steps // G

    if cross_in_bf16:
        # Accuracy trade-off: halves streamed HBM bytes, native-rate MXU.
        x_stream = x.astype(jnp.bfloat16)
        hcm2_in = hcm2.astype(jnp.bfloat16)
        precision = None
    else:
        x_stream, hcm2_in = x, hcm2
        precision = lax.Precision.HIGHEST   # keep the f32 contraction truly f32

    kernel = functools.partial(
        _hcc_euc_kernel, block_n=tn, steps_per_core=steps_per_core,
        mid_n=half_n, mid_m=half_m, margin=float(margin_euc),
        precision=precision)

    partials = pl.pallas_call(
        kernel,
        out_shape=jax.ShapeDtypeStruct((G, M, 2), jnp.float32),
        grid=(G, steps_per_core),
        in_specs=[
            pl.BlockSpec((tn, C), lambda g, i: (g * steps_per_core + i, 0)),
            pl.BlockSpec((1, tn), lambda g, i: (0, g * steps_per_core + i)),
            pl.BlockSpec((M, C), lambda g, i: (0, 0)),      # resident centroids
            pl.BlockSpec((M, 1), lambda g, i: (0, 0)),      # resident ||hc||^2
            pl.BlockSpec((1, tn), lambda g, i: (0, g * steps_per_core + i)),
            pl.BlockSpec((M, 1), lambda g, i: (0, 0)),      # resident pidhc
        ],
        out_specs=pl.BlockSpec((1, M, 2), lambda g, i: (g, 0, 0)),
        compiler_params=pltpu.CompilerParams(
            dimension_semantics=("parallel", "arbitrary"),
            vmem_limit_bytes=int(vmem_limit)),
    )(x_stream, x2_row, hcm2_in, hc2, pid_row, pidhc_col)

    nums = jnp.sum(partials, axis=(0, 1))                   # (2,)
    # NOTE: like the reference, den1 > 0 is assumed (NaN otherwise, same as torch).
    return nums[0] / den1 + nums[1] / den2


def _ref_loss(x, pids, margin=0.6):
    """Pure numpy reference mirroring the PyTorch forward."""
    x = np.asarray(x, np.float64)
    pids = np.asarray(pids)
    p = len(np.unique(pids))
    c = x.shape[-1]
    pidhc = pids.reshape(2 * p, -1)[:, 0]
    hcen = x.reshape(2 * p, -1, c).mean(axis=1)
    d2 = ((x * x).sum(1)[:, None] + (hcen * hcen).sum(1)[None, :]
          - 2.0 * x @ hcen.T)
    dist = np.sqrt(np.clip(d2, 1e-12, None))
    mask = pids[:, None] == pidhc[None, :]
    n, m = dist.shape
    sel = np.concatenate([dist[:n // 2, m // 2:][mask[:n // 2, m // 2:]],
                          dist[n // 2:, :m // 2][mask[n // 2:, :m // 2]]])
    loss1 = sel.mean()
    loss2 = np.clip(margin - dist[~mask], 0.0, None).mean()
    return loss1 + loss2


if __name__ == "__main__":
    # Cross-modality ReID-style batch: p = 8 identities, 2 modalities,
    # per_group = 16 samples each -> N = 2*p*per_group = 256, C = 32 features.
    # Layout: [modality-A pids 0..p-1 | modality-B pids 0..p-1] so the
    # off-diagonal blocks of the sample-vs-centroid matrix contain matches.
    key = jax.random.PRNGKey(0)
    p, per_group, C = 8, 16, 32
    N = 2 * p * per_group
    x = 0.05 * jax.random.normal(key, (N, C), dtype=jnp.float32)
    pids_np = np.tile(np.repeat(np.arange(p), per_group), 2).astype(np.int32)
    pids = jnp.asarray(pids_np)

    ref = _ref_loss(np.asarray(x), pids_np, margin=0.6)

    # 1) explicit small tile -> exercises the 2-way core split (G=2, 2 tiles).
    loss_tiled = jax.block_until_ready(
        hcc_euc_loss(x, pids, margin_euc=0.6, num_pids=p, block_n=128))
    # 2) automatic VMEM-budgeted tile (single full-size tile at this shape).
    loss_auto = jax.block_until_ready(
        hcc_euc_loss(x, pids, margin_euc=0.6, num_pids=p))

    for name, val in (("tiled", loss_tiled), ("auto", loss_auto)):
        v = float(val)
        if not np.isfinite(v):
            raise RuntimeError(f"{name}: kernel produced non-finite loss")
        if not np.allclose(v, ref, rtol=5e-3, atol=5e-3):
            raise RuntimeError(f"{name} mismatch: pallas={v} ref={ref}")

    print("KERNEL_OK")
</pallas_src>

<mosaic_0001>
module attributes {stable_mosaic.version = 11 : i64} {
  func.func @_hcc_euc_kernel(%arg0: i32, %arg1: i32, %arg2: memref<128x32xf32, #tpu.memory_space<vmem>>, %arg3: memref<1x128xf32, #tpu.memory_space<vmem>>, %arg4: memref<16x32xf32, #tpu.memory_space<vmem>>, %arg5: memref<16x1xf32, #tpu.memory_space<vmem>>, %arg6: memref<1x128xi32, #tpu.memory_space<vmem>>, %arg7: memref<16x1xi32, #tpu.memory_space<vmem>>, %arg8: memref<1x16x2xf32, #tpu.memory_space<vmem>>) attributes {dimension_semantics = [#tpu.dimension_semantics<parallel>, #tpu.dimension_semantics<arbitrary>], iteration_bounds = array<i64: 2, 1>, scalar_prefetch = 0 : i64, scratch_operands = 0 : i64, tpu.core_type = #tpu.core_type<tc>, window_params = [{transform_indices = @transform_0, window_bounds = array<i64: 128, 32>}, {transform_indices = @transform_1, window_bounds = array<i64: 1, 128>}, {pipeline_mode = #tpu.pipeline_mode<synchronous>, transform_indices = @transform_2, window_bounds = array<i64: 16, 32>}, {pipeline_mode = #tpu.pipeline_mode<synchronous>, transform_indices = @transform_3, window_bounds = array<i64: 16, 1>}, {transform_indices = @transform_4, window_bounds = array<i64: 1, 128>}, {pipeline_mode = #tpu.pipeline_mode<synchronous>, transform_indices = @transform_5, window_bounds = array<i64: 16, 1>}, {transform_indices = @transform_6, window_bounds = array<i64: 1, 16, 2>}]} {
    %c0_i32 = arith.constant 0 : i32
    %0 = arith.cmpi eq, %arg1, %c0_i32 : i32
    %1 = arith.extui %0 : i1 to i32
    %c0_i32_0 = arith.constant 0 : i32
    %2 = arith.cmpi ne, %1, %c0_i32_0 : i32
    scf.if %2 {
      %cst_25 = arith.constant 0.000000e+00 : f32
      %55 = vector.broadcast %cst_25 : f32 to vector<1x16x2xf32>
      %c0_26 = arith.constant 0 : index
      %c0_27 = arith.constant 0 : index
      %c0_28 = arith.constant 0 : index
      %56 = vector.load %arg8[%c0_26, %c0_27, %c0_28] : memref<1x16x2xf32, #tpu.memory_space<vmem>>, vector<1x16x2xf32>
      tpu.vector_store %arg8[%c0_26, %c0_27, %c0_28], %55 {strides = array<i32>} : memref<1x16x2xf32, #tpu.memory_space<vmem>>, vector<1x16x2xf32>,
    } else {
    }
    %c0 = arith.constant 0 : index
    %c0_1 = arith.constant 0 : index
    %3 = vector.load %arg4[%c0, %c0_1] : memref<16x32xf32, #tpu.memory_space<vmem>>, vector<16x32xf32>
    %c0_2 = arith.constant 0 : index
    %c0_3 = arith.constant 0 : index
    %4 = vector.load %arg2[%c0_2, %c0_3] : memref<128x32xf32, #tpu.memory_space<vmem>>, vector<128x32xf32>
    %cst = arith.constant dense<0.000000e+00> : vector<16x128xf32>
    %5 = tpu.matmul %3, %4, %cst {dimension_numbers = #tpu.dot_dimension_numbers<[1], [1], [0], [0], [0, 0, 1, 0], [], []>, precision = #tpu.contract_precision<fp32>} : vector<16x32xf32>, vector<128x32xf32>, vector<16x128xf32> -> vector<16x128xf32>
    %c0_4 = arith.constant 0 : index
    %c0_5 = arith.constant 0 : index
    %6 = vector.load %arg5[%c0_4, %c0_5] : memref<16x1xf32, #tpu.memory_space<vmem>>, vector<16x1xf32>
    %c0_6 = arith.constant 0 : index
    %c0_7 = arith.constant 0 : index
    %7 = vector.load %arg3[%c0_6, %c0_7] : memref<1x128xf32, #tpu.memory_space<vmem>>, vector<1x128xf32>
    %8 = vector.broadcast %6 : vector<16x1xf32> to vector<16x128xf32>
    %9 = vector.broadcast %7 : vector<1x128xf32> to vector<16x128xf32>
    %10 = arith.addf %8, %9 : vector<16x128xf32>
    %11 = arith.addf %10, %5 : vector<16x128xf32>
    %cst_8 = arith.constant 9.99999996E-13 : f32
    %12 = vector.broadcast %cst_8 : f32 to vector<16x128xf32>
    %13 = arith.maximumf %11, %12 : vector<16x128xf32>
    %14 = math.sqrt %13 : vector<16x128xf32>
    %c0_9 = arith.constant 0 : index
    %c0_10 = arith.constant 0 : index
    %15 = vector.load %arg7[%c0_9, %c0_10] : memref<16x1xi32, #tpu.memory_space<vmem>>, vector<16x1xi32>
    %c0_11 = arith.constant 0 : index
    %c0_12 = arith.constant 0 : index
    %16 = vector.load %arg6[%c0_11, %c0_12] : memref<1x128xi32, #tpu.memory_space<vmem>>, vector<1x128xi32>
    %17 = vector.broadcast %15 : vector<16x1xi32> to vector<16x128xi32>
    %18 = vector.broadcast %16 : vector<1x128xi32> to vector<16x128xi32>
    %19 = arith.cmpi eq, %17, %18 : vector<16x128xi32>
    %c1_i32 = arith.constant 1 : i32
    %20 = arith.muli %arg0, %c1_i32 : i32
    %21 = arith.addi %20, %arg1 : i32
    %c128_i32 = arith.constant 128 : i32
    %22 = arith.muli %c128_i32, %21 : i32
    %23 = tpu.iota {dimensions = array<i32: 1>} : vector<1x128xi32>
    %24 = vector.broadcast %22 : i32 to vector<1x128xi32>
    %25 = arith.addi %24, %23 : vector<1x128xi32>
    %26 = tpu.iota {dimensions = array<i32: 0>} : vector<16x1xi32>
    %c128_i32_13 = arith.constant 128 : i32
    %27 = vector.broadcast %c128_i32_13 : i32 to vector<1x128xi32>
    %28 = arith.cmpi slt, %25, %27 : vector<1x128xi32>
    %c8_i32 = arith.constant 8 : i32
    %29 = vector.broadcast %c8_i32 : i32 to vector<16x1xi32>
    %30 = arith.cmpi slt, %26, %29 : vector<16x1xi32>
    %31 = vector.broadcast %28 : vector<1x128xi1> to vector<16x128xi1>
    %32 = vector.broadcast %30 : vector<16x1xi1> to vector<16x128xi1>
    %33 = arith.xori %31, %32 : vector<16x128xi1>
    %34 = arith.andi %19, %33 : vector<16x128xi1>
    %35 = arith.extui %34 : vector<16x128xi1> to vector<16x128xi32>
    %36 = arith.sitofp %35 : vector<16x128xi32> to vector<16x128xf32>
    %cst_14 = arith.constant dense<true> : vector<16x128xi1>
    %37 = arith.xori %19, %cst_14 : vector<16x128xi1>
    %38 = arith.extui %37 : vector<16x128xi1> to vector<16x128xi32>
    %39 = arith.sitofp %38 : vector<16x128xi32> to vector<16x128xf32>
    %cst_15 = arith.constant 6.000000e-01 : f32
    %40 = vector.broadcast %cst_15 : f32 to vector<16x128xf32>
    %41 = arith.subf %40, %14 : vector<16x128xf32>
    %cst_16 = arith.constant 0.000000e+00 : f32
    %42 = vector.broadcast %cst_16 : f32 to vector<16x128xf32>
    %43 = arith.maximumf %41, %42 : vector<16x128xf32>
    %44 = arith.mulf %14, %36 : vector<16x128xf32>
    %cst_17 = arith.constant dense<0.000000e+00> : vector<16xf32>
    %45 = vector.multi_reduction <add>, %44, %cst_17 [1] : vector<16x128xf32> to vector<16xf32>
    %46 = vector.shape_cast %45 : vector<16xf32> to vector<16x1xf32>
    %47 = arith.mulf %43, %39 : vector<16x128xf32>
    %cst_18 = arith.constant dense<0.000000e+00> : vector<16xf32>
    %48 = vector.multi_reduction <add>, %47, %cst_18 [1] : vector<16x128xf32> to vector<16xf32>
    %49 = vector.shape_cast %48 : vector<16xf32> to vector<16x1xf32>
    %c0_19 = arith.constant 0 : index
    %c0_20 = arith.constant 0 : index
    %c0_21 = arith.constant 0 : index
    %50 = vector.load %arg8[%c0_19, %c0_20, %c0_21] : memref<1x16x2xf32, #tpu.memory_space<vmem>>, vector<1x16x2xf32>
    %51 = tpu.concatenate %46, %49 in 1 : vector<16x1xf32>, vector<16x1xf32> -> vector<16x2xf32>
    %52 = vector.shape_cast %51 : vector<16x2xf32> to vector<1x16x2xf32>
    %53 = arith.addf %50, %52 : vector<1x16x2xf32>
    %c0_22 = arith.constant 0 : index
    %c0_23 = arith.constant 0 : index
    %c0_24 = arith.constant 0 : index
    %54 = vector.load %arg8[%c0_22, %c0_23, %c0_24] : memref<1x16x2xf32, #tpu.memory_space<vmem>>, vector<1x16x2xf32>
    tpu.vector_store %arg8[%c0_22, %c0_23, %c0_24], %53 {strides = array<i32>} : memref<1x16x2xf32, #tpu.memory_space<vmem>>, vector<1x16x2xf32>,
    return
  }
  func.func @transform_0(%arg0: i32, %arg1: i32) -> (i32, i32) {
    %c1_i32 = arith.constant 1 : i32
    %0 = arith.muli %arg0, %c1_i32 : i32
    %1 = arith.addi %0, %arg1 : i32
    %c0_i32 = arith.constant 0 : i32
    %c0_i32_0 = arith.constant 0 : i32
    return %1, %c0_i32 : i32, i32
  }
  func.func @transform_1(%arg0: i32, %arg1: i32) -> (i32, i32) {
    %c1_i32 = arith.constant 1 : i32
    %0 = arith.muli %arg0, %c1_i32 : i32
    %1 = arith.addi %0, %arg1 : i32
    %c0_i32 = arith.constant 0 : i32
    %c0_i32_0 = arith.constant 0 : i32
    return %c0_i32, %1 : i32, i32
  }
  func.func @transform_2(%arg0: i32, %arg1: i32) -> (i32, i32) {
    %c0_i32 = arith.constant 0 : i32
    %c0_i32_0 = arith.constant 0 : i32
    %c0_i32_1 = arith.constant 0 : i32
    return %c0_i32, %c0_i32_0 : i32, i32
  }
  func.func @transform_3(%arg0: i32, %arg1: i32) -> (i32, i32) {
    %c0_i32 = arith.constant 0 : i32
    %c0_i32_0 = arith.constant 0 : i32
    %c0_i32_1 = arith.constant 0 : i32
    return %c0_i32, %c0_i32_0 : i32, i32
  }
  func.func @transform_4(%arg0: i32, %arg1: i32) -> (i32, i32) {
    %c1_i32 = arith.constant 1 : i32
    %0 = arith.muli %arg0, %c1_i32 : i32
    %1 = arith.addi %0, %arg1 : i32
    %c0_i32 = arith.constant 0 : i32
    %c0_i32_0 = arith.constant 0 : i32
    return %c0_i32, %1 : i32, i32
  }
  func.func @transform_5(%arg0: i32, %arg1: i32) -> (i32, i32) {
    %c0_i32 = arith.constant 0 : i32
    %c0_i32_0 = arith.constant 0 : i32
    %c0_i32_1 = arith.constant 0 : i32
    return %c0_i32, %c0_i32_0 : i32, i32
  }
  func.func @transform_6(%arg0: i32, %arg1: i32) -> (i32, i32, i32) {
    %c0_i32 = arith.constant 0 : i32
    %c0_i32_0 = arith.constant 0 : i32
    %c0_i32_1 = arith.constant 0 : i32
    return %arg0, %c0_i32, %c0_i32_0 : i32, i32, i32
  }
}

</mosaic_0001>

<bundles_post_ra>
// kernel: tpu_custom_call.1
= control target key start
LH: loop header
LB: loop body
LE: loop exit
PB: predicated region body
PF: predicated region fallthrough
CT: control target
= control target key end

     0   :  { %s1110_s21 = smov 0   ;;  %s1112_s22 = smov 0   ;;  %s1437_s0 = inlined_call_operand.vmem [shape: f32[256,32], index: 0, kind: input, shape index: {}]   ;;  %s1438_s1 = inlined_call_operand.vmem [shape: f32[1,256], index: 1, kind: input, shape index: {}]   ;;  %s1439_s2 = inlined_call_operand.vmem [shape: f32[16,32], index: 2, kind: input, shape index: {}]   ;;  %s1440_s3 = inlined_call_operand.vmem [shape: f32[16,1], index: 3, kind: input, shape index: {}]   ;;  %s1441_s4 = inlined_call_operand.vmem [shape: s32[1,256], index: 4, kind: input, shape index: {}]   ;;  %s1442_s5 = inlined_call_operand.vmem [shape: s32[16,1], index: 5, kind: input, shape index: {}]   ;;  %s1443_s6 = inlined_call_operand.vmem [shape: f32[2,16,2], index: 6, kind: output, shape index: {}]  }
   0x1   :  { %s1114_s23 = smov 0  }
   0x2 LB: > { %s28_s24 = sadd.s32 1, %s1066_s22  ;;  %p968_p0 = scmp.ge.s32.totalorder %s1070_s23, 1  ;;  %s1070_s23 = sphi %s1114_s23, %s16_s23   ;;  %s1066_s22 = sphi %s1112_s22, %s1445_s22   ;;  %s1062_s21 = sphi %s1110_s21, %s1444_s21  }
   0x3   : > { %p30_p1 = scmp.ge.s32.totalorder %s28_s24, 2  ;;  %p253_p2 = scmp.lt.s32.totalorder %s1070_s23, 3 }
   0x5   : > { %s1447_s24 = smov (%p30_p1, %s28_s24), 0  ;;  %p254_p3 = pnand %p968_p0, %p253_p2 }
   0x6   : > { %s969_s25 = sshll.u32 (!%p254_p3), %s1062_s21, 4  ;;  %p301_p5 = scmp.lt.s32.totalorder (!%p254_p3), %s1062_s21, 1 }
   0x7   : > { %257 = sbr.rel (%p254_p3) target bundleno = 437 (0x1b5), region = 44  ;;  %p294_p4 = scmp.lt.s32.totalorder (!%p254_p3), %s969_s25, 31 }
   0x8   : > { %s973_s7 = sshll.u32 (!%p254_p3), %s1062_s21, 7 }
   0xc   : > { %s1449_s25 = smov (!%p294_p4, %s969_s25), 31  ;;  %vm340_vm0 = vcmask 261120   ;;  %vm1073_vm2 = vmmov 1   ;;  %vm319_vm14 = vcmask 15360   ;;  %vm875_vm15 = vcmask 7168  }
   0xd   : > { %s970_s26 = sshll.u32 %s1449_s25, 3 }
   0xe   : > { %s1134_s29 = scalar_lea.vmem %s1437_s0, %s970_s26 }
   0xf   : > { %v339_v0 = vld [vmem:[%s1134_s29 + $0x78] sm:$0xff]  ;;  %v338_v1 = vld [vmem:[%s1134_s29 + $0x70] sm:$0xff]  ;;  %v337_v2 = vld [vmem:[%s1134_s29 + $0x68] sm:$0xff]  ;;  %s1340_s10 = scalar_select %p301_p5, %s1062_s21, 1 }
  0x10   : > { %v393_v3 = vsel %vm340_vm0, %v339_v0, 0  ;;  %v390_v4 = vsel %vm340_vm0, %v338_v1, 0  ;;  %v387_v5 = vsel %vm340_vm0, %v337_v2, 0  ;;  %v336_v6 = vld [vmem:[%s1134_s29 + $0x60] sm:$0xff]  ;;  %v335_v7 = vld [vmem:[%s1134_s29 + $0x58] sm:$0xff]  ;;  %v334_v17 = vld [vmem:[%s1134_s29 + $0x50] sm:$0xff] }
  0x11   : > { %v1144_v8 = vand.u32 4294901760, %v393_v3  ;;  %v1146_v9 = vand.u32 4294901760, %v390_v4  ;;  %v1148_v10 = vand.u32 4294901760, %v387_v5  ;;  %v384_v11 = vsel %vm340_vm0, %v336_v6, 0  ;;  %v333_v26 = vld [vmem:[%s1134_s29 + $0x48] sm:$0xff]  ;;  %v332_v34 = vld [vmem:[%s1134_s29 + $0x40] sm:$0xff]  ;;  %s303_s13 = scalar_lea.vmem %s1438_s1, %s1340_s10  ;;  %s308_s28 = scalar_lea.vmem %s1441_s4, %s1340_s10 }
  0x12   : > { %v1151_v12 = vand.u32 4294901760, %v384_v11  ;;  %v381_v16 = vsel %vm340_vm0, %v335_v7, 0  ;;  %v378_v21 = vsel %vm340_vm0, %v334_v17, 0  ;;  %v375_v29 = vsel %vm340_vm0, %v333_v26, 0  ;;  %v331_v41 = vld [vmem:[%s1134_s29 + $0x38] sm:$0xff]  ;;  %v330_v48 = vld [vmem:[%s1134_s29 + $0x30] sm:$0xff] }
  0x13   : > { %396 = vmatpush.xpose.msra.mxu0 %v1144_v8  ;;  %v445_v13 = vsub.f32 %v393_v3, %v1144_v8  ;;  %609 = vmatpush.xpose.msra.mxu3 %v1144_v8  ;;  %v451_v14 = vsub.f32 %v390_v4, %v1146_v9  ;;  %v457_v15 = vsub.f32 %v387_v5, %v1148_v10  ;;  %v1164_v20 = vand.u32 4294901760, %v381_v16  ;;  %v329_v54 = vld [vmem:[%s1134_s29 + $0x28] sm:$0xff]  ;;  %v328_v62 = vld [vmem:[%s1134_s29 + $0x20] sm:$0xff]  ;;  %v327_v5 = vld [vmem:[%s1134_s29 + $0x18] sm:$0xff]  ;;  %s980_s21 = sshll.u32 %s1340_s10, 4 }
  0x14   : > { %v463_v24 = vsub.f32 %v384_v11, %v1151_v12  ;;  %v1175_v28 = vand.u32 4294901760, %v378_v21  ;;  %v1185_v35 = vand.u32 4294901760, %v375_v29  ;;  %v372_v36 = vsel %vm340_vm0, %v332_v34, 0 }
  0x15   : > { %551 = vmatpush.xpose.msra.mxu2 %v445_v13  ;;  %v1160_v18 = vand.u32 4294901760, %v445_v13  ;;  %v1162_v19 = vand.u32 4294901760, %v451_v14  ;;  %v1172_v25 = vand.u32 4294901760, %v457_v15  ;;  %v469_v32 = vsub.f32 %v381_v16, %v1164_v20  ;;  %v326_v16 = vld [vmem:[%s1134_s29 + $0x10] sm:$0xff] }
  0x16   : > { %v1181_v33 = vand.u32 4294901760, %v463_v24  ;;  %v475_v39 = vsub.f32 %v378_v21, %v1175_v28  ;;  %v1195_v42 = vand.u32 4294901760, %v372_v36  ;;  %v481_v45 = vsub.f32 %v375_v29, %v1185_v35 }
  0x17   : > { %398 = vmatpush.xpose.msra.mxu0 %v1146_v9  ;;  %v447_v22 = vsub.f32 %v445_v13, %v1160_v18  ;;  %611 = vmatpush.xpose.msra.mxu3 %v1146_v9  ;;  %v453_v23 = vsub.f32 %v451_v14, %v1162_v19  ;;  %v459_v31 = vsub.f32 %v457_v15, %v1172_v25  ;;  %v1191_v40 = vand.u32 4294901760, %v469_v32 }
  0x18   : > { %v465_v38 = vsub.f32 %v463_v24, %v1181_v33  ;;  %v1200_v46 = vand.u32 4294901760, %v475_v39  ;;  %v369_v47 = vsel %vm340_vm0, %v331_v41, 0  ;;  %v487_v49 = vsub.f32 %v372_v36, %v1195_v42 }
  0x19   : > { %554 = vmatpush.xpose.msra.mxu2 %v451_v14  ;;  %v448_v27 = vand.u32 4294901760, %v447_v22  ;;  %v454_v30 = vand.u32 4294901760, %v453_v23  ;;  %v460_v37 = vand.u32 4294901760, %v459_v31  ;;  %v471_v44 = vsub.f32 %v469_v32, %v1191_v40 }
  0x1a   : > { %v466_v43 = vand.u32 4294901760, %v465_v38  ;;  %v477_v51 = vsub.f32 %v475_v39, %v1200_v46  ;;  %v1208_v52 = vand.u32 4294901760, %v369_v47  ;;  %v1210_v53 = vand.u32 4294901760, %v481_v45 }
  0x1b   : > { %400 = vmatpush.xpose.msra.mxu0 %v1148_v10  ;;  %449 = vmatpush.xpose.msra.mxu1 %v448_v27  ;;  %v472_v50 = vand.u32 4294901760, %v471_v44  ;;  %v366_v55 = vsel %vm340_vm0, %v330_v48, 0  ;;  %v1215_v56 = vand.u32 4294901760, %v487_v49  ;;  %v363_v57 = vsel %vm340_vm0, %v329_v54, 0  ;;  %v325_v27 = vld [vmem:[%s1134_s29 + $0x8] sm:$0xff] }
  0x1c   : > { %613 = vmatpush.xpose.msra.mxu3 %v1148_v10  ;;  %v478_v58 = vand.u32 4294901760, %v477_v51  ;;  %v483_v59 = vsub.f32 %v481_v45, %v1210_v53  ;;  %v493_v60 = vsub.f32 %v369_v47, %v1208_v52  ;;  %v1221_v61 = vand.u32 4294901760, %v366_v55 }
  0x1d   : > { %557 = vmatpush.xpose.msra.mxu2 %v457_v15  ;;  %v489_v63 = vsub.f32 %v487_v49, %v1215_v56  ;;  %v1226_v0 = vand.u32 4294901760, %v363_v57  ;;  %v360_v4 = vsel %vm340_vm0, %v328_v62, 0  ;;  %v357_v15 = vsel %vm340_vm0, %v327_v5, 0 }
  0x1e   : > { %v484_v1 = vand.u32 4294901760, %v483_v59  ;;  %v499_v2 = vsub.f32 %v366_v55, %v1221_v61  ;;  %v1230_v3 = vand.u32 4294901760, %v493_v60  ;;  %v1235_v6 = vand.u32 4294901760, %v360_v4 }
  0x1f   : > { %402 = vmatpush.xpose.msra.mxu0 %v1151_v12  ;;  %455 = vmatpush.xpose.msra.mxu1 %v454_v30  ;;  %v490_v7 = vand.u32 4294901760, %v489_v63  ;;  %v505_v13 = vsub.f32 %v363_v57, %v1226_v0  ;;  %v1248_v23 = vand.u32 4294901760, %v357_v15  ;;  %v354_v26 = vsel %vm340_vm0, %v326_v16, 0 }
  0x20   : > { %615 = vmatpush.xpose.msra.mxu3 %v1151_v12  ;;  %v495_v11 = vsub.f32 %v493_v60, %v1230_v3  ;;  %v1240_v14 = vand.u32 4294901760, %v499_v2  ;;  %v511_v17 = vsub.f32 %v360_v4, %v1235_v6  ;;  %v1260_v34 = vand.u32 4294901760, %v354_v26  ;;  %v322_v4 = vld [vmem:[%s1439_s2] sm:$0xff] }
  0x21   : > { %560 = vmatpush.xpose.msra.mxu2 %v463_v24  ;;  %v1250_v24 = vand.u32 4294901760, %v505_v13  ;;  %v351_v36 = vsel %vm340_vm0, %v325_v27, 0  ;;  %v342_v5 = vsel %vm340_vm0, %v322_v4, 0 }
  0x22   : > { %v496_v21 = vand.u32 4294901760, %v495_v11  ;;  %v501_v22 = vsub.f32 %v499_v2, %v1240_v14  ;;  %v1255_v29 = vand.u32 4294901760, %v511_v17  ;;  %v523_v41 = vsub.f32 %v354_v26, %v1260_v34  ;;  %v1042_v26 = vld [vmem:[%s303_s13] ss:$0 sm:$0xff]  ;;  %s314_s13 = scalar_lea.vmem %s1443_s6, %s980_s21 }
  0x23   : > { %404 = vmatpush.xpose.msra.mxu0 %v1164_v20  ;;  %461 = vmatpush.xpose.msra.mxu1 %v460_v37  ;;  %v507_v31 = vsub.f32 %v505_v13, %v1250_v24  ;;  %v324_v37 = vld [vmem:[%s1134_s29] sm:$0xff] }
  0x24   : > { %617 = vmatpush.xpose.msra.mxu3 %v1164_v20  ;;  %v502_v30 = vand.u32 4294901760, %v501_v22  ;;  %v513_v38 = vsub.f32 %v511_v17, %v1255_v29  ;;  %v1279_v51 = vand.u32 4294901760, %v523_v41 }
  0x25   : > { %563 = vmatpush.xpose.msra.mxu2 %v469_v32  ;;  %v517_v32 = vsub.f32 %v357_v15, %v1248_v23 }
  0x26   : > { %v514_v47 = vand.u32 4294901760, %v513_v38  ;;  %v525_v55 = vsub.f32 %v523_v41, %v1279_v51 }
  0x27   : > { %406 = vmatpush.xpose.msra.mxu0 %v1175_v28  ;;  %467 = vmatpush.xpose.msra.mxu1 %v466_v43  ;;  %v1268_v43 = vand.u32 4294901760, %v351_v36  ;;  %v1270_v44 = vand.u32 4294901760, %v517_v32 }
  0x28   : > { %619 = vmatpush.xpose.msra.mxu3 %v1175_v28  ;;  %v526_v59 = vand.u32 4294901760, %v525_v55 }
  0x29   : > { %566 = vmatpush.xpose.msra.mxu2 %v475_v39  ;;  %v508_v39 = vand.u32 4294901760, %v507_v31  ;;  %v519_v48 = vsub.f32 %v517_v32, %v1270_v44 }
  0x2b   : > { %408 = vmatpush.xpose.msra.mxu0 %v1185_v35  ;;  %473 = vmatpush.xpose.msra.mxu1 %v472_v50  ;;  %v520_v54 = vand.u32 4294901760, %v519_v48 }
  0x2c   : > { %621 = vmatpush.xpose.msra.mxu3 %v1185_v35 }
  0x2d   : > { %569 = vmatpush.xpose.msra.mxu2 %v481_v45  ;;  %v348_v45 = vsel %vm340_vm0, %v324_v37, 0 }
  0x2e   : > { %v1277_v50 = vand.u32 4294901760, %v348_v45 }
  0x2f   : > { %410 = vmatpush.xpose.msra.mxu0 %v1195_v42  ;;  %479 = vmatpush.xpose.msra.mxu1 %v478_v58 }
  0x30   : > { %623 = vmatpush.xpose.msra.mxu3 %v1195_v42  ;;  %v535_v57 = vsub.f32 %v348_v45, %v1277_v50 }
  0x31   : > { %572 = vmatpush.xpose.msra.mxu2 %v487_v49  ;;  %v529_v49 = vsub.f32 %v351_v36, %v1268_v43 }
  0x32   : > { %v1290_v62 = vand.u32 4294901760, %v535_v57 }
  0x33   : > { %412 = vmatpush.xpose.msra.mxu0 %v1208_v52  ;;  %485 = vmatpush.xpose.msra.mxu1 %v484_v1  ;;  %v1285_v58 = vand.u32 4294901760, %v529_v49 }
  0x34   : > { %625 = vmatpush.xpose.msra.mxu3 %v1208_v52  ;;  %v537_v1 = vsub.f32 %v535_v57, %v1290_v62 }
  0x35   : > { %575 = vmatpush.xpose.msra.mxu2 %v493_v60  ;;  %v531_v60 = vsub.f32 %v529_v49, %v1285_v58 }
  0x37   : > { %414 = vmatpush.xpose.msra.mxu0 %v1221_v61  ;;  %491 = vmatpush.xpose.msra.mxu1 %v490_v7  ;;  %v532_v63 = vand.u32 4294901760, %v531_v60  ;;  %v1305_v7 = vand.u32 4294901760, %v342_v5 }
  0x38   : > { %627 = vmatpush.xpose.msra.mxu3 %v1221_v61 }
  0x39   : > { %578 = vmatpush.xpose.msra.mxu2 %v499_v2  ;;  %v538_v2 = vand.u32 4294901760, %v537_v1  ;;  %v428_v11 = vsub.f32 %v342_v5, %v1305_v7 }
  0x3b   : > { %416 = vmatpush.xpose.msra.mxu0 %v1226_v0  ;;  %497 = vmatpush.xpose.msra.mxu1 %v496_v21 }
  0x3c   : > { %629 = vmatpush.xpose.msra.mxu3 %v1226_v0 }
  0x3d   : > { %581 = vmatpush.xpose.msra.mxu2 %v505_v13 }
  0x3f   : > { %418 = vmatpush.xpose.msra.mxu0 %v1235_v6  ;;  %503 = vmatpush.xpose.msra.mxu1 %v502_v30 }
  0x40   : > { %631 = vmatpush.xpose.msra.mxu3 %v1235_v6 }
  0x41   : > { %584 = vmatpush.xpose.msra.mxu2 %v511_v17 }
  0x43   : > { %420 = vmatpush.xpose.msra.mxu0 %v1248_v23  ;;  %509 = vmatpush.xpose.msra.mxu1 %v508_v39 }
  0x44   : > { %633 = vmatpush.xpose.msra.mxu3 %v1248_v23 }
  0x45   : > { %587 = vmatpush.xpose.msra.mxu2 %v517_v32 }
  0x47   : > { %422 = vmatpush.xpose.msra.mxu0 %v1260_v34  ;;  %515 = vmatpush.xpose.msra.mxu1 %v514_v47 }
  0x48   : > { %635 = vmatpush.xpose.msra.mxu3 %v1260_v34 }
  0x49   : > { %590 = vmatpush.xpose.msra.mxu2 %v523_v41 }
  0x4b   : > { %424 = vmatpush.xpose.msra.mxu0 %v1268_v43  ;;  %521 = vmatpush.xpose.msra.mxu1 %v520_v54 }
  0x4c   : > { %637 = vmatpush.xpose.msra.mxu3 %v1268_v43 }
  0x4d   : > { %593 = vmatpush.xpose.msra.mxu2 %v529_v49 }
  0x4f   : > { %426 = vmatpush.xpose.msra.mxu0 %v1277_v50  ;;  %527 = vmatpush.xpose.msra.mxu1 %v526_v59  ;;  %v1043_v59 = vld [vmem:[%s308_s28] ss:$0 sm:$0xff] }
  0x50   : > { %639 = vmatpush.xpose.msra.mxu3 %v1277_v50 }
  0x51   : > { %596 = vmatpush.xpose.msra.mxu2 %v535_v57 }
  0x53   : > { %656 = vmatpush.xpose.msrb.mxu0 %v1160_v18  ;;  %533 = vmatpush.xpose.msra.mxu1 %v532_v63 }
  0x54   : > { %997 = vmatpush.xpose.msrb.mxu3 %v1144_v8  ;;  %599 = vmatmul.f32.vlgmr.msra.gmra.mxu2 %v428_v11 }
  0x55   : > { %981 = vmatpush.xpose.msrb.mxu2 %v1160_v18  ;;  %v429_v18 = vand.u32 4294901760, %v428_v11 }
  0x57   : > { %660 = vmatpush.xpose.msrb.mxu0 %v1162_v19  ;;  %539 = vmatpush.xpose.msra.mxu1 %v538_v2  ;;  %v430_v13 = vsub.f32 %v428_v11, %v429_v18 }
  0x58   : > { %998 = vmatpush.xpose.msrb.mxu3 %v1146_v9 }
  0x59   : > { %982 = vmatpush.xpose.msrb.mxu2 %v1162_v19  ;;  %643 = vmatmul.f32.vlgmr.msra.gmra.mxu3 %v429_v18  ;;  %v323_v19 = vld [vmem:[%s1439_s2 + $0x8] sm:$0xff]  ;;  %v431_v15 = vand.u32 4294901760, %v430_v13 }
  0x5a   : > { %541 = vmatmul.f32.vlgmr.msra.gmra.mxu1 %v1305_v7 }
  0x5b   : > { %664 = vmatpush.xpose.msrb.mxu0 %v1172_v25  ;;  %727 = vmatpush.xpose.msrb.mxu1 %v1144_v8  ;;  %v345_v8 = vsel %vm340_vm0, %v323_v19, 0 }
  0x5c   : > { %999 = vmatpush.xpose.msrb.mxu3 %v1148_v10  ;;  %v1321_v16 = vand.u32 4294901760, %v345_v8  ;;  %432 = vmatmul.f32.vlgmr.msra.gmra.mxu0 %v431_v15 }
  0x5d   : > { %983 = vmatpush.xpose.msrb.mxu2 %v1172_v25 }
  0x5e   : > { %v436_v25 = vsub.f32 %v345_v8, %v1321_v16  ;;  %v1074_v8 = vmov 0.0  }
  0x5f   : > { %668 = vmatpush.xpose.msrb.mxu0 %v1181_v33  ;;  %729 = vmatpush.xpose.msrb.mxu1 %v1146_v9  ;;  %320 = vst.msk [vmem:[%s314_s13] sm:$0xff] %vm319_vm14, %v1074_v8 }
  0x60   : > { %1000 = vmatpush.xpose.msrb.mxu3 %v1151_v12  ;;  %v437_v9 = vand.u32 4294901760, %v436_v25  ;;  %604 = vmatmul.f32.gmra.mxu2 %v436_v25  ;;  %321 = vst.msk [vmem:[%s314_s13 + $0x8] sm:$0xff] %vm319_vm14, %v1074_v8 }
  0x61   : > { %984 = vmatpush.xpose.msrb.mxu2 %v1181_v33 }
  0x62   : > { %545 = vmatmul.f32.gmra.mxu1 %v1321_v16  ;;  %v438_v17 = vsub.f32 %v436_v25, %v437_v9  ;;  %649 = vmatmul.f32.gmra.mxu3 %v437_v9 }
  0x63   : > { %672 = vmatpush.xpose.msrb.mxu0 %v1191_v40  ;;  %731 = vmatpush.xpose.msrb.mxu1 %v1148_v10  ;;  %v767_v10 = vld [vmem:[%s1440_s3] sm:$0xff] }
  0x64   : > { %1001 = vmatpush.xpose.msrb.mxu3 %v1164_v20  ;;  %v439_v33 = vand.u32 4294901760, %v438_v17 }
  0x65   : > { %985 = vmatpush.xpose.msrb.mxu2 %v1191_v40 }
  0x66   : > { %440 = vmatmul.f32.gmra.mxu0 %v439_v33 }
  0x67   : > { %676 = vmatpush.xpose.msrb.mxu0 %v1200_v46  ;;  %733 = vmatpush.xpose.msrb.mxu1 %v1151_v12  ;;  %v1072_v12 = vmov 0  }
  0x68   : > { %1002 = vmatpush.xpose.msrb.mxu3 %v1175_v28  ;;  %1040 = vset.pattern.permute.xlu0 %v1072_v12 }
  0x69   : > { %986 = vmatpush.xpose.msrb.mxu2 %v1200_v46  ;;  %772 = vperm.xlu0 %1040, %v767_v10  }
  0x6a   : > { %1041 = vset.pattern.permute.xlu1 %v1072_v12 }
  0x6b   : > { %680 = vmatpush.xpose.msrb.mxu0 %v1210_v53  ;;  %735 = vmatpush.xpose.msrb.mxu1 %v1164_v20  ;;  %v813_v20 = vld [vmem:[%s1442_s5] sm:$0xff] }
  0x6c   : > { %1003 = vmatpush.xpose.msrb.mxu3 %v1185_v35  ;;  %817 = vperm.xlu1 %1041, %v813_v20  }
  0x6d   : > { %987 = vmatpush.xpose.msrb.mxu2 %v1210_v53 }
  0x6f   : > { %684 = vmatpush.xpose.msrb.mxu0 %v1215_v56  ;;  %737 = vmatpush.xpose.msrb.mxu1 %v1175_v28  ;;  %v768_v28 = vld [vmem:[%s1440_s3 + $0x8] sm:$0xff] }
  0x70   : > { %1004 = vmatpush.xpose.msrb.mxu3 %v1195_v42 }
  0x71   : > { %988 = vmatpush.xpose.msrb.mxu2 %v1215_v56  ;;  %777 = vperm.xlu0 %1040, %v768_v28  }
  0x73   : > { %688 = vmatpush.xpose.msrb.mxu0 %v1230_v3  ;;  %739 = vmatpush.xpose.msrb.mxu1 %v1185_v35  ;;  %v814_v35 = vld [vmem:[%s1442_s5 + $0x8] sm:$0xff] }
  0x74   : > { %1005 = vmatpush.xpose.msrb.mxu3 %v1208_v52  ;;  %820 = vperm.xlu1 %1041, %v814_v35  }
  0x75   : > { %989 = vmatpush.xpose.msrb.mxu2 %v1230_v3 }
  0x77   : > { %692 = vmatpush.xpose.msrb.mxu0 %v1240_v14  ;;  %741 = vmatpush.xpose.msrb.mxu1 %v1195_v42 }
  0x78   : > { %1006 = vmatpush.xpose.msrb.mxu3 %v1221_v61 }
  0x79   : > { %990 = vmatpush.xpose.msrb.mxu2 %v1240_v14 }
  0x7b   : > { %696 = vmatpush.xpose.msrb.mxu0 %v1250_v24  ;;  %743 = vmatpush.xpose.msrb.mxu1 %v1208_v52 }
  0x7c   : > { %1007 = vmatpush.xpose.msrb.mxu3 %v1226_v0 }
  0x7d   : > { %991 = vmatpush.xpose.msrb.mxu2 %v1250_v24 }
  0x7f   : > { %700 = vmatpush.xpose.msrb.mxu0 %v1255_v29  ;;  %745 = vmatpush.xpose.msrb.mxu1 %v1221_v61 }
  0x80   : > { %1008 = vmatpush.xpose.msrb.mxu3 %v1235_v6 }
  0x81   : > { %992 = vmatpush.xpose.msrb.mxu2 %v1255_v29 }
  0x83   : > { %704 = vmatpush.xpose.msrb.mxu0 %v1270_v44  ;;  %747 = vmatpush.xpose.msrb.mxu1 %v1226_v0 }
  0x84   : > { %1009 = vmatpush.xpose.msrb.mxu3 %v1248_v23 }
  0x85   : > { %993 = vmatpush.xpose.msrb.mxu2 %v1270_v44  ;;  %v827_v44 = vlaneseq }
  0x87   : > { %708 = vmatpush.xpose.msrb.mxu0 %v1279_v51  ;;  %749 = vmatpush.xpose.msrb.mxu1 %v1235_v6  ;;  %v828_v49 = vand.u32 127, %v827_v44 }
  0x88   : > { %1010 = vmatpush.xpose.msrb.mxu3 %v1260_v34 }
  0x89   : > { %994 = vmatpush.xpose.msrb.mxu2 %v1279_v51 }
  0x8b   : > { %712 = vmatpush.xpose.msrb.mxu0 %v1285_v58  ;;  %751 = vmatpush.xpose.msrb.mxu1 %v1248_v23 }
  0x8c   : > { %1011 = vmatpush.xpose.msrb.mxu3 %v1268_v43 }
  0x8d   : > { %995 = vmatpush.xpose.msrb.mxu2 %v1285_v58 }
  0x8f   : > { %716 = vmatpush.xpose.msrb.mxu0 %v1290_v62  ;;  %753 = vmatpush.xpose.msrb.mxu1 %v1260_v34 }
  0x90   : > { %1012 = vmatpush.xpose.msrb.mxu3 %v1277_v50 }
  0x91   : > { %996 = vmatpush.xpose.msrb.mxu2 %v1290_v62 }
  0x92   : > { %718 = vmatmul.f32.vlgmr.msrb.gmra.mxu0 %v1305_v7 }
  0x93   : > { %755 = vmatpush.xpose.msrb.mxu1 %v1268_v43  ;;  %763 = vmatmul.f32.vlgmr.msrb.gmra.mxu3 %v1321_v16 }
  0x94   : > { %722 = vmatmul.f32.vlgmr.msrb.gmra.mxu2 %v1321_v16 }
  0x97   : > { %757 = vmatpush.xpose.msrb.mxu1 %v1277_v50  ;;  %v829_v50 = vstv %s973_s7 }
  0x98   : > { %v830_v51 = vadd.s32 %v829_v50, %v828_v49 }
  0x9a   : > { %759 = vmatmul.f32.vlgmr.msrb.gmra.mxu1 %v1305_v7  ;;  %vm834_vm1 = vcmp.lt.s32.totalorder %v830_v51, 128 }
  0x9b   : > { %vm843_vm3 = vmxor %vm834_vm1, %vm1073_vm2 }
  0xd7   : > { %v542_v42 = vpop.f32.mrf.mxu1  ;;  %v600_v52 = vpop.f32.mrf.mxu2 }
  0xd9   : > { %v433_v40 = vpop.f32.mrf.mxu0 }
  0xda   : > { %v543_v61 = vadd.f32 %v542_v42, %v433_v40 }
  0xdb   : > { %v773_v0 = vpop.permute.xlu0 %772 }
  0xdc   : > { %v644_v46 = vpop.f32.mrf.mxu3  ;;  %v601_v21 = vadd.f32 %v600_v52, %v543_v61  ;;  %v783_v36 = vadd.f32 %v1042_v26, %v773_v0 }
  0xde   : > { %v645_v24 = vadd.f32 %v644_v46, %v601_v21  ;;  %v818_v55 = vpop.permute.xlu1 %817 }
  0xdf   : > { %v546_v56 = vpop.f32.mrf.mxu1  ;;  %vm823_vm4 = vcmp.eq.s32.totalorder %v818_v55, %v1043_v59 }
  0xe0   : > { %vm845_vm5 = vmand %vm823_vm4, %vm843_vm3 }
  0xe1   : > { %v974_v15 = vsel %vm845_vm5, 1.0, %v1074_v8  ;;  %vm851_vm10 = vmxor %vm823_vm4, %vm1073_vm2 }
  0xe2   : > { %v976_v40 = vsel %vm851_vm10, 1.0, %v1074_v8 }
  0xe3   : > { %v441_v53 = vpop.f32.mrf.mxu0  ;;  %v605_v6 = vpop.f32.mrf.mxu2 }
  0xe4   : > { %v547_v14 = vadd.f32 %v546_v56, %v441_v53  ;;  %v778_v30 = vpop.permute.xlu0 %777 }
  0xe5   : > { %v650_v3 = vpop.f32.mrf.mxu3  ;;  %v784_v39 = vadd.f32 %v1042_v26, %v778_v30 }
  0xe6   : > { %v606_v22 = vadd.f32 %v605_v6, %v547_v14  ;;  %v821_v11 = vpop.permute.xlu1 %820 }
  0xe7   : > { %vm824_vm8 = vcmp.eq.s32.totalorder %v821_v11, %v1043_v59 }
  0xe8   : > { %v651_v29 = vadd.f32 %v650_v3, %v606_v22  ;;  %vm852_vm12 = vmxor %vm824_vm8, %vm1073_vm2  ;;  %v873_v3 = vld [vmem:[%s314_s13] sm:$0xff]  ;;  %v874_v22 = vld [vmem:[%s314_s13 + $0x8] sm:$0xff] }
  0xe9   : > { %vm846_vm13 = vmand %vm824_vm8, %vm834_vm1  ;;  %v977_v52 = vsel %vm852_vm12, 1.0, %v1074_v8 }
  0xea   : > { %v975_v56 = vsel %vm846_vm13, 1.0, %v1074_v8 }
 0x10f   : > { %v719_v23 = vpop.f32.mrf.mxu0 }
 0x110   : > { %v720_v27 = vadd.f32 %v719_v23, %v645_v24 }
 0x116   : > { %v764_v31 = vpop.f32.mrf.mxu3 }
 0x117   : > { %v723_v32 = vpop.f32.mrf.mxu2  ;;  %v760_v34 = vpop.f32.mrf.mxu1 }
 0x118   : > { %v724_v37 = vadd.f32 %v723_v32, %v651_v29  ;;  %v761_v38 = vadd.f32 %v760_v34, %v720_v27 }
 0x11a   : > { %v785_v41 = vadd.f32 %v783_v36, %v761_v38  ;;  %v765_v43 = vadd.f32 %v764_v31, %v724_v37 }
 0x11c   : > { %v787_v45 = vmax.f32 %v785_v41, 1e-12  ;;  %v786_v47 = vadd.f32 %v784_v39, %v765_v43 }
 0x11e   : > { %v788_v48 = vmax.f32 %v786_v47, 1e-12  ;;  %1044 = vrsqrt.f32 %v787_v45  ;;  %vm796_vm6 = vcmp.eq.f32.partialorder %v787_v45, inf  ;;  %v799_v19 = vand.u32 2147483648, %v787_v45 }
 0x11f   : > { %vm798_vm7 = vcmp.eq.f32.partialorder %v787_v45, 0.0 }
 0x120   : > { %1046 = vrsqrt.f32 %v788_v48  ;;  %vm808_vm9 = vcmp.eq.f32.partialorder %v788_v48, inf  ;;  %v811_v17 = vand.u32 2147483648, %v788_v48  ;;  %vm810_vm11 = vcmp.eq.f32.partialorder %v788_v48, 0.0 }
 0x124   : > { %v1045_v54 = vpop.eup %1044 }
 0x125   : > { %v790_v57 = vmul.f32 %v1045_v54, %v787_v45 }
 0x126   : > { %v1047_v58 = vpop.eup %1046 }
 0x127   : > { %v791_v60 = vmul.f32 %v1045_v54, %v790_v57  ;;  %v802_v62 = vmul.f32 %v1047_v58, %v788_v48 }
 0x129   : > { %v792_v63 = vmul.f32 0.5, %v791_v60  ;;  %v803_v1 = vmul.f32 %v1047_v58, %v802_v62 }
 0x12b   : > { %v793_v2 = vsub.f32 1.5, %v792_v63  ;;  %v804_v4 = vmul.f32 0.5, %v803_v1 }
 0x12d   : > { %v794_v5 = vmul.f32 %v1045_v54, %v793_v2  ;;  %v805_v7 = vsub.f32 1.5, %v804_v4 }
 0x12f   : > { %v795_v18 = vmul.f32 %v794_v5, %v787_v45  ;;  %v806_v13 = vmul.f32 %v1047_v58, %v805_v7 }
 0x131   : > { %v797_v16 = vsel %vm796_vm6, %v787_v45, %v795_v18  ;;  %v807_v25 = vmul.f32 %v806_v13, %v788_v48 }
 0x132   : > { %v800_v9 = vsel %vm798_vm7, %v799_v19, %v797_v16 }
 0x133   : > { %v861_v33 = vmul.f32 %v974_v15, %v800_v9  ;;  %v857_v10 = vsub.f32 0.6, %v800_v9  ;;  %v809_v12 = vsel %vm808_vm9, %v788_v48, %v807_v25 }
 0x134   : > { %v812_v20 = vsel %vm810_vm11, %v811_v17, %v809_v12 }
 0x135   : > { %863 = vadd.xlane.f32.xlu2 %v861_v33  ;;  %v859_v28 = vmax.f32 %v857_v10, 0.0  ;;  %v858_v35 = vsub.f32 0.6, %v812_v20  ;;  %v862_v61 = vmul.f32 %v975_v56, %v812_v20 }
 0x137   : > { %v867_v42 = vmul.f32 %v976_v40, %v859_v28  ;;  %v860_v46 = vmax.f32 %v858_v35, 0.0 }
 0x139   : > { %869 = vadd.xlane.f32.xlu0 %v867_v42  ;;  %v868_v53 = vmul.f32 %v977_v52, %v860_v46 }
 0x13b   : > { %871 = vadd.xlane.f32.xlu1 %v868_v53 }
 0x13d   : > { %865 = vadd.xlane.f32.xlu2 %v862_v61 }
 0x1a8   : > { %v864_v0 = vpop.xlane.xlu2 %863 }
 0x1ac   : > { %v870_v6 = vpop.xlane.xlu0 %869 }
 0x1ad   : > { %v876_v14 = vsel %vm875_vm15, %v864_v0, %v870_v6 }
 0x1ae   : > { %v878_v21 = vadd.f32 %v876_v14, %v873_v3  ;;  %v872_v23 = vpop.xlane.xlu1 %871 }
 0x1b0   : > { %881 = vst.msk [vmem:[%s314_s13] sm:$0xff] %vm319_vm14, %v878_v21  ;;  %v866_v24 = vpop.xlane.xlu2 %865 }
 0x1b1   : > { %v877_v26 = vsel %vm875_vm15, %v866_v24, %v872_v23 }
 0x1b2   : > { %v879_v27 = vadd.f32 %v877_v26, %v874_v22 }
 0x1b4   : > { %882 = vst.msk [vmem:[%s314_s13 + $0x8] sm:$0xff] %vm319_vm14, %v879_v27 }
 0x1b5 PF: > { %s16_s23 = sadd.s32 1, %s1070_s23   ;;  %s1444_s21 = smov %s1066_s22 }
 0x1b6   : > { %p13_p6 = scmp.ge.s32.totalorder %s16_s23, 4   ;;  %s1445_s22 = smov %s1447_s24 }
 0x1b8   :  { %15 = sbr.rel (!%p13_p6) target bundleno = 2 (0x2), region = 84 }

</bundles_post_ra>
